<compile_context>
chip_gen: v5e
topology: v5e:2x2
jax: 0.10.0
libtpu: 0.0.40
codegen_flags: <defaults>
</compile_context>

<pallas_src>
import jax
import jax.numpy as jnp
from jax.experimental import pallas as pl
from jax.experimental.pallas import tpu as pltpu


def _make_mlp_kernel(num_linear_layers):
    """Fused MLP kernel on the transposed (features, TILE_B) layout."""

    def kernel(ei_ref, eu_ref, *refs):
        o_ref = refs[-1]
        wb = refs[:-1]
        # layer 0 replaces torch.cat([ei, eu], 1) with a split matmul:
        #   y = W0[:emb_dim]^T @ ei^T + W0[emb_dim:]^T @ eu^T + b0
        w0_ei = wb[0][...].astype(jnp.float32)   # (h0, emb_dim)
        w0_eu = wb[1][...].astype(jnp.float32)   # (h0, emb_dim)
        b0 = wb[2][...].astype(jnp.float32)      # (h0, 1)
        x = (jnp.dot(w0_ei, ei_ref[...].astype(jnp.float32),
                     preferred_element_type=jnp.float32)
             + jnp.dot(w0_eu, eu_ref[...].astype(jnp.float32),
                       preferred_element_type=jnp.float32)
             + b0)
        if num_linear_layers > 1:        # layer 0 is a hidden layer -> relu
            x = jnp.maximum(x, 0.0)

        for li in range(1, num_linear_layers):
            w = wb[3 + 2 * (li - 1)][...].astype(jnp.float32)      # (out, in)
            b = wb[3 + 2 * (li - 1) + 1][...].astype(jnp.float32)  # (out, 1)
            x = jnp.dot(w, x, preferred_element_type=jnp.float32) + b
            if li < num_linear_layers - 1:   # relu on hidden layers only
                x = jnp.maximum(x, 0.0)

        o_ref[...] = x.astype(o_ref.dtype)

    return kernel


def recommender_forward(eu, ei, params, *, max_tile_b=8192,
                        compute_dtype=jnp.float32):
    """params: list of (W, b) with W shaped (in, out), b shaped (1, out).

    Returns (B, out_dim) float32 (out_dim == 1 for the regression head).
    """
    B, emb_dim = eu.shape
    num_linear = len(params)
    out_dim = params[-1][0].shape[1]

    # ---- batch tiling: pad B up to a multiple of a lane-dense TILE_B -------
    tile_b = min(max(int(pl.cdiv(B, 128)) * 128, 128), max_tile_b)
    b_pad = int(pl.cdiv(B, tile_b)) * tile_b

    # ---- transposed + padded inputs: (emb_dim, B_pad), batch on lanes ------
    ei_t = jnp.pad(ei.astype(compute_dtype).T, ((0, 0), (0, b_pad - B)))
    eu_t = jnp.pad(eu.astype(compute_dtype).T, ((0, 0), (0, b_pad - B)))

    # ---- transposed weights; first layer split to avoid in-kernel concat ---
    w0, b0 = params[0]
    wb_arrays = [
        w0[:emb_dim, :].T.astype(compute_dtype),   # (h0, emb_dim)
        w0[emb_dim:, :].T.astype(compute_dtype),   # (h0, emb_dim)
        b0.T.astype(jnp.float32),                  # (h0, 1)
    ]
    for w, b in params[1:]:
        wb_arrays.append(w.T.astype(compute_dtype))  # (out, in)
        wb_arrays.append(b.T.astype(jnp.float32))    # (out, 1)

    def _resident_spec(arr):
        nd = arr.ndim
        return pl.BlockSpec(arr.shape, lambda i, _nd=nd: (0,) * _nd)

    in_specs = [
        pl.BlockSpec((emb_dim, tile_b), lambda i: (0, i)),   # ei^T tile
        pl.BlockSpec((emb_dim, tile_b), lambda i: (0, i)),   # eu^T tile
    ] + [_resident_spec(a) for a in wb_arrays]               # VMEM-resident

    out_spec = pl.BlockSpec((out_dim, tile_b), lambda i: (0, i))

    # ---- advisory cost estimate (op is HBM-bandwidth bound) ----------------
    layer_dims = ([(2 * emb_dim, params[0][0].shape[1])]
                  + [(w.shape[0], w.shape[1]) for w, _ in params[1:]])
    flops = 2 * B * sum(fi * fo for fi, fo in layer_dims)
    in_bytes = 2 * emb_dim * b_pad * jnp.dtype(compute_dtype).itemsize
    out_bytes = out_dim * b_pad * 4
    w_bytes = sum(int(a.size) * jnp.dtype(a.dtype).itemsize for a in wb_arrays)
    cost = pl.CostEstimate(flops=flops, transcendentals=0,
                           bytes_accessed=in_bytes + out_bytes + w_bytes)

    kernel = _make_mlp_kernel(num_linear)

    out_padded = pl.pallas_call(
        kernel,
        out_shape=jax.ShapeDtypeStruct((out_dim, b_pad), jnp.float32),
        grid_spec=pl.GridSpec(
            grid=(b_pad // tile_b,),
            in_specs=in_specs,
            out_specs=out_spec,
        ),
        compiler_params=pltpu.CompilerParams(
            dimension_semantics=("parallel",),   # shards tiles across TCs on v7x
        ),
        cost_estimate=cost,
    )(ei_t, eu_t, *wb_arrays)

    return out_padded[:, :B].T   # (B, out_dim)


def init_params(key, emb_dim, layer_num):
    """Deterministic parameter init mirroring the torch module's layer shapes."""
    input_size = emb_dim * 2
    last_size = input_size
    layer_dims = []
    for _ in range(layer_num - 1):
        out_dim = int(last_size / 2)
        layer_dims.append((last_size, out_dim))
        last_size = out_dim
    layer_dims.append((last_size, 1))  # final regression layer

    params = []
    for (fan_in, fan_out) in layer_dims:
        key, kw, kb = jax.random.split(key, 3)
        bound = 1.0 / jnp.sqrt(jnp.float32(fan_in))
        # stored as (in, out) == torch Linear weight (out, in) transposed
        w = jax.random.uniform(kw, (fan_in, fan_out), jnp.float32, -bound, bound)
        b = jax.random.uniform(kb, (1, fan_out), jnp.float32, -bound, bound)
        params.append((w, b))
    return params


def reference_forward(eu, ei, params):
    """Plain-JAX reference for correctness checking."""
    x = jnp.concatenate([ei, eu], axis=1)
    n = len(params)
    for i, (w, b) in enumerate(params):
        x = x @ w + b
        if i < n - 1:
            x = jnp.maximum(x, 0.0)
    return x


if __name__ == "__main__":
    emb_dim = 16
    layer_num = 3
    batch = 8

    key = jax.random.PRNGKey(0)
    key, ku, ki = jax.random.split(key, 3)
    eu = jax.random.normal(ku, (batch, emb_dim), jnp.float32)
    ei = jax.random.normal(ki, (batch, emb_dim), jnp.float32)

    params = init_params(key, emb_dim, layer_num)

    out = recommender_forward(eu, ei, params)
    out = jax.block_until_ready(out)

    ref = reference_forward(eu, ei, params)
    assert out.shape == (batch, 1), out.shape
    assert jnp.allclose(out, ref, atol=1e-5, rtol=1e-5), (out, ref)

    # second check: multi-tile grid + ragged batch (padded inside the wrapper)
    key, ku2, ki2 = jax.random.split(key, 3)
    batch2 = 300
    eu2 = jax.random.normal(ku2, (batch2, emb_dim), jnp.float32)
    ei2 = jax.random.normal(ki2, (batch2, emb_dim), jnp.float32)
    out2 = jax.block_until_ready(
        recommender_forward(eu2, ei2, params, max_tile_b=128))
    ref2 = reference_forward(eu2, ei2, params)
    assert out2.shape == (batch2, 1), out2.shape
    assert jnp.allclose(out2, ref2, atol=1e-5, rtol=1e-5)

    print("KERNEL_OK")
</pallas_src>

<mosaic_0001>
module attributes {stable_mosaic.version = 11 : i64} {
  func.func @kernel(%arg0: i32, %arg1: memref<16x128xf32, #tpu.memory_space<vmem>>, %arg2: memref<16x128xf32, #tpu.memory_space<vmem>>, %arg3: memref<16x16xf32, #tpu.memory_space<vmem>>, %arg4: memref<16x16xf32, #tpu.memory_space<vmem>>, %arg5: memref<16x1xf32, #tpu.memory_space<vmem>>, %arg6: memref<8x16xf32, #tpu.memory_space<vmem>>, %arg7: memref<8x1xf32, #tpu.memory_space<vmem>>, %arg8: memref<1x8xf32, #tpu.memory_space<vmem>>, %arg9: memref<1x1xf32, #tpu.memory_space<vmem>>, %arg10: memref<1x128xf32, #tpu.memory_space<vmem>>) attributes {dimension_semantics = [#tpu.dimension_semantics<parallel>], iteration_bounds = array<i64: 1>, scalar_prefetch = 0 : i64, scratch_operands = 0 : i64, tpu.core_type = #tpu.core_type<tc>, window_params = [{transform_indices = @transform_0, window_bounds = array<i64: 16, 128>}, {transform_indices = @transform_1, window_bounds = array<i64: 16, 128>}, {pipeline_mode = #tpu.pipeline_mode<synchronous>, transform_indices = @transform_2, window_bounds = array<i64: 16, 16>}, {pipeline_mode = #tpu.pipeline_mode<synchronous>, transform_indices = @transform_3, window_bounds = array<i64: 16, 16>}, {pipeline_mode = #tpu.pipeline_mode<synchronous>, transform_indices = @transform_4, window_bounds = array<i64: 16, 1>}, {pipeline_mode = #tpu.pipeline_mode<synchronous>, transform_indices = @transform_5, window_bounds = array<i64: 8, 16>}, {pipeline_mode = #tpu.pipeline_mode<synchronous>, transform_indices = @transform_6, window_bounds = array<i64: 8, 1>}, {pipeline_mode = #tpu.pipeline_mode<synchronous>, transform_indices = @transform_7, window_bounds = array<i64: 1, 8>}, {pipeline_mode = #tpu.pipeline_mode<synchronous>, transform_indices = @transform_8, window_bounds = array<i64: 1, 1>}, {transform_indices = @transform_9, window_bounds = array<i64: 1, 128>}]} {
    %c0 = arith.constant 0 : index
    %c0_0 = arith.constant 0 : index
    %0 = vector.load %arg3[%c0, %c0_0] : memref<16x16xf32, #tpu.memory_space<vmem>>, vector<16x16xf32>
    %c0_1 = arith.constant 0 : index
    %c0_2 = arith.constant 0 : index
    %1 = vector.load %arg4[%c0_1, %c0_2] : memref<16x16xf32, #tpu.memory_space<vmem>>, vector<16x16xf32>
    %c0_3 = arith.constant 0 : index
    %c0_4 = arith.constant 0 : index
    %2 = vector.load %arg5[%c0_3, %c0_4] : memref<16x1xf32, #tpu.memory_space<vmem>>, vector<16x1xf32>
    %c0_5 = arith.constant 0 : index
    %c0_6 = arith.constant 0 : index
    %3 = vector.load %arg1[%c0_5, %c0_6] : memref<16x128xf32, #tpu.memory_space<vmem>>, vector<16x128xf32>
    %cst = arith.constant dense<0.000000e+00> : vector<16x128xf32>
    %4 = tpu.matmul %0, %3, %cst {dimension_numbers = #tpu.dot_dimension_numbers<[1], [0], [0], [1], [0, 0, 1, 1], [], []>} : vector<16x16xf32>, vector<16x128xf32>, vector<16x128xf32> -> vector<16x128xf32>
    %c0_7 = arith.constant 0 : index
    %c0_8 = arith.constant 0 : index
    %5 = vector.load %arg2[%c0_7, %c0_8] : memref<16x128xf32, #tpu.memory_space<vmem>>, vector<16x128xf32>
    %cst_9 = arith.constant dense<0.000000e+00> : vector<16x128xf32>
    %6 = tpu.matmul %1, %5, %cst_9 {dimension_numbers = #tpu.dot_dimension_numbers<[1], [0], [0], [1], [0, 0, 1, 1], [], []>} : vector<16x16xf32>, vector<16x128xf32>, vector<16x128xf32> -> vector<16x128xf32>
    %7 = arith.addf %4, %6 : vector<16x128xf32>
    %8 = vector.broadcast %2 : vector<16x1xf32> to vector<16x128xf32>
    %9 = arith.addf %7, %8 : vector<16x128xf32>
    %cst_10 = arith.constant 0.000000e+00 : f32
    %10 = vector.broadcast %cst_10 : f32 to vector<16x128xf32>
    %11 = arith.maximumf %9, %10 : vector<16x128xf32>
    %c0_11 = arith.constant 0 : index
    %c0_12 = arith.constant 0 : index
    %12 = vector.load %arg6[%c0_11, %c0_12] : memref<8x16xf32, #tpu.memory_space<vmem>>, vector<8x16xf32>
    %c0_13 = arith.constant 0 : index
    %c0_14 = arith.constant 0 : index
    %13 = vector.load %arg7[%c0_13, %c0_14] : memref<8x1xf32, #tpu.memory_space<vmem>>, vector<8x1xf32>
    %cst_15 = arith.constant dense<0.000000e+00> : vector<8x128xf32>
    %14 = tpu.matmul %12, %11, %cst_15 {dimension_numbers = #tpu.dot_dimension_numbers<[1], [0], [0], [1], [0, 0, 1, 1], [], []>} : vector<8x16xf32>, vector<16x128xf32>, vector<8x128xf32> -> vector<8x128xf32>
    %15 = vector.broadcast %13 : vector<8x1xf32> to vector<8x128xf32>
    %16 = arith.addf %14, %15 : vector<8x128xf32>
    %cst_16 = arith.constant 0.000000e+00 : f32
    %17 = vector.broadcast %cst_16 : f32 to vector<8x128xf32>
    %18 = arith.maximumf %16, %17 : vector<8x128xf32>
    %c0_17 = arith.constant 0 : index
    %c0_18 = arith.constant 0 : index
    %19 = vector.load %arg8[%c0_17, %c0_18] : memref<1x8xf32, #tpu.memory_space<vmem>>, vector<1x8xf32>
    %c0_19 = arith.constant 0 : index
    %c0_20 = arith.constant 0 : index
    %20 = vector.load %arg9[%c0_19, %c0_20] : memref<1x1xf32, #tpu.memory_space<vmem>>, vector<1x1xf32>
    %cst_21 = arith.constant dense<0.000000e+00> : vector<1x128xf32>
    %21 = tpu.matmul %19, %18, %cst_21 {dimension_numbers = #tpu.dot_dimension_numbers<[1], [0], [0], [1], [0, 0, 1, 1], [], []>} : vector<1x8xf32>, vector<8x128xf32>, vector<1x128xf32> -> vector<1x128xf32>
    %22 = vector.broadcast %20 : vector<1x1xf32> to vector<1x128xf32>
    %23 = arith.addf %21, %22 : vector<1x128xf32>
    %c0_22 = arith.constant 0 : index
    %c0_23 = arith.constant 0 : index
    %24 = vector.load %arg10[%c0_22, %c0_23] : memref<1x128xf32, #tpu.memory_space<vmem>>, vector<1x128xf32>
    tpu.vector_store %arg10[%c0_22, %c0_23], %23 {strides = array<i32>} : memref<1x128xf32, #tpu.memory_space<vmem>>, vector<1x128xf32>,
    return
  }
  func.func @transform_0(%arg0: i32) -> (i32, i32) {
    %c0_i32 = arith.constant 0 : i32
    %c0_i32_0 = arith.constant 0 : i32
    return %c0_i32, %arg0 : i32, i32
  }
  func.func @transform_1(%arg0: i32) -> (i32, i32) {
    %c0_i32 = arith.constant 0 : i32
    %c0_i32_0 = arith.constant 0 : i32
    return %c0_i32, %arg0 : i32, i32
  }
  func.func @transform_2(%arg0: i32) -> (i32, i32) {
    %c0_i32 = arith.constant 0 : i32
    %c0_i32_0 = arith.constant 0 : i32
    %c0_i32_1 = arith.constant 0 : i32
    return %c0_i32, %c0_i32_0 : i32, i32
  }
  func.func @transform_3(%arg0: i32) -> (i32, i32) {
    %c0_i32 = arith.constant 0 : i32
    %c0_i32_0 = arith.constant 0 : i32
    %c0_i32_1 = arith.constant 0 : i32
    return %c0_i32, %c0_i32_0 : i32, i32
  }
  func.func @transform_4(%arg0: i32) -> (i32, i32) {
    %c0_i32 = arith.constant 0 : i32
    %c0_i32_0 = arith.constant 0 : i32
    %c0_i32_1 = arith.constant 0 : i32
    return %c0_i32, %c0_i32_0 : i32, i32
  }
  func.func @transform_5(%arg0: i32) -> (i32, i32) {
    %c0_i32 = arith.constant 0 : i32
    %c0_i32_0 = arith.constant 0 : i32
    %c0_i32_1 = arith.constant 0 : i32
    return %c0_i32, %c0_i32_0 : i32, i32
  }
  func.func @transform_6(%arg0: i32) -> (i32, i32) {
    %c0_i32 = arith.constant 0 : i32
    %c0_i32_0 = arith.constant 0 : i32
    %c0_i32_1 = arith.constant 0 : i32
    return %c0_i32, %c0_i32_0 : i32, i32
  }
  func.func @transform_7(%arg0: i32) -> (i32, i32) {
    %c0_i32 = arith.constant 0 : i32
    %c0_i32_0 = arith.constant 0 : i32
    %c0_i32_1 = arith.constant 0 : i32
    return %c0_i32, %c0_i32_0 : i32, i32
  }
  func.func @transform_8(%arg0: i32) -> (i32, i32) {
    %c0_i32 = arith.constant 0 : i32
    %c0_i32_0 = arith.constant 0 : i32
    %c0_i32_1 = arith.constant 0 : i32
    return %c0_i32, %c0_i32_0 : i32, i32
  }
  func.func @transform_9(%arg0: i32) -> (i32, i32) {
    %c0_i32 = arith.constant 0 : i32
    %c0_i32_0 = arith.constant 0 : i32
    return %c0_i32, %arg0 : i32, i32
  }
}

</mosaic_0001>

<bundles_post_ra>
// kernel: tpu_custom_call.1
= control target key start
LH: loop header
LB: loop body
LE: loop exit
PB: predicated region body
PF: predicated region fallthrough
CT: control target
= control target key end

     0   :  { %s462_s0 = inlined_call_operand.vmem [shape: f32[16,128], index: 0, kind: input, shape index: {}]   ;;  %s463_s1 = inlined_call_operand.hbm [shape: f32[16,128], index: 1, kind: input, shape index: {}]   ;;  %s464_s2 = inlined_call_operand.hbm [shape: f32[16,16], index: 2, kind: input, shape index: {}]   ;;  %s465_s3 = inlined_call_operand.hbm [shape: f32[16,16], index: 3, kind: input, shape index: {}]   ;;  %s466_s4 = inlined_call_operand.vmem [shape: f32[16,1], index: 4, kind: input, shape index: {}]   ;;  %s467_s5 = inlined_call_operand.vmem [shape: f32[8,16], index: 5, kind: input, shape index: {}]   ;;  %s468_s6 = inlined_call_operand.vmem [shape: f32[8,1], index: 6, kind: input, shape index: {}]   ;;  %s469_s7 = inlined_call_operand.vmem [shape: f32[1,8], index: 7, kind: input, shape index: {}]   ;;  %s470_s8 = inlined_call_operand.<no memory space> [shape: f32[1,1], index: 8, kind: input, shape index: {}]   ;;  %s471_s9 = inlined_call_operand.hbm [shape: f32[1,128], index: 9, kind: output, shape index: {}]  }
   0x1   :  { %v14_v0 = vstv %s470_s8 }
   0x2   :  { %15 = vst [vmem:[#allocation2] sm:$0x1] %v14_v0 }
   0x3   :  { %16 = vsyncpa [#allocation4], 0 }
   0x4   :  { %17 = vsyncpa [#allocation7], 0 }
   0x5   :  { %18 = vsyncpa [#allocation5], 0  ;;  %s38_s13 = sshll.u32 %s464_s2, 4  ;;  %s364_s14 = smov [#allocation6]   ;;  %s39_s13 = int_to_ptr.hbm [resolvable:$true] %s38_s13 }
   0x6   :  { %s40_s15 = sshll.u32 %s364_s14, 4  ;;  %s25_s18 = sshll.u32 %s463_s1, 4  ;;  %s41_s15 = int_to_ptr.vmem [resolvable:$true] %s40_s15  ;;  %s26_s18 = int_to_ptr.hbm [resolvable:$true] %s25_s18 }
   0x7   :  { %s365_s19 = smov 128   ;;  %s366_s20 = smov 8  }
   0x8   :  { %46 = dma.hbm_to_vmem [thread:$0]  %s39_s13, 256, %s41_s15, [#allocation7], %s365_s19, %s365_s19, %s366_s20  }
   0x9   :  { %s367_s8 = smov [#allocation3]   ;;  %s51_s24 = sshll.u32 %s465_s3, 4  ;;  %s52_s24 = int_to_ptr.hbm [resolvable:$true] %s51_s24 }
   0xa   :  { %s27_s21 = sshll.u32 %s367_s8, 4  ;;  %s368_s2 = smov [#allocation8]   ;;  %s28_s21 = int_to_ptr.vmem [resolvable:$true] %s27_s21 }
   0xb   :  { %33 = dma.hbm_to_vmem [thread:$0]  %s26_s18, 256, %s28_s21, [#allocation4], %s365_s19, %s365_s19, %s366_s20  }
   0xc   :  { %s53_s25 = sshll.u32 %s368_s2, 4  ;;  %s54_s25 = int_to_ptr.vmem [resolvable:$true] %s53_s25 }
   0xd   :  { %59 = dma.hbm_to_vmem [thread:$0]  %s52_s24, 256, %s54_s25, [#allocation7], %s365_s19, %s365_s19, %s366_s20  }
   0xe   :  { %358 = dma.done.wait [#allocation4], 256  }
   0xf   :  { %359 = vsyncadd [#allocation4], 4294967040 }
  0x10   :  { %360 = dma.done.wait [#allocation7], 512  }
  0x11   :  { %361 = vsyncadd [#allocation7], 4294966784  ;;  %v369_v1 = vmov 0   ;;  %v91_v2 = vld [vmem:[#allocation3 + $0x8] sm:$0xff]  ;;  %v90_v4 = vld [vmem:[#allocation3] sm:$0xff]  ;;  %vm92_vm0 = vcmask 130048  }
  0x12   :  { %260 = vset.pattern.permute.xlu0 %v369_v1  ;;  %261 = vset.pattern.permute.xlu1 %v369_v1  ;;  %v89_v3 = vld [vmem:[%s462_s0 + $0x8] sm:$0xff]  ;;  %v88_v5 = vld [vmem:[%s462_s0] sm:$0xff]  ;;  %v82_v7 = vld [vmem:[#allocation6] sm:$0xff]  ;;  %vm204_vm1 = vcmask 64512   ;;  %s370_s14 = smov [#allocation9]  }
  0x13   :  { %113 = vmatpush.msra.mxu0 %v91_v2  ;;  %142 = vmatpush.msra.mxu1 %v89_v3  ;;  %v84_v6 = vld [vmem:[#allocation8] sm:$0xff]  ;;  %v85_v9 = vld [vmem:[#allocation8 + $0x8] sm:$0xff]  ;;  %v83_v10 = vld [vmem:[#allocation6 + $0x8] sm:$0xff]  ;;  %s234_s15 = sshll.u32 %s370_s14, 4  ;;  %s235_s15 = int_to_ptr.vmem [resolvable:$true] %s234_s15 }
  0x14   :  { %v87_v8 = vld [vmem:[%s466_s4 + $0x8] sm:$0xff]  ;;  %v86_v11 = vld [vmem:[%s466_s4] sm:$0xff] }
  0x15   :  { %114 = vmatpush.msra.mxu0 %v90_v4  ;;  %143 = vmatpush.msra.mxu1 %v88_v5  ;;  %v166_v12 = vld [vmem:[%s468_s6] sm:$0xff] }
  0x16   :  { %247 = vmatmul.msk.f32.vlgmr.msra.gmra.mxu0 %vm92_vm0, %v84_v6  ;;  %249 = vmatmul.msk.f32.vlgmr.msra.gmra.mxu1 %vm92_vm0, %v82_v7  ;;  %v197_v13 = vld [vmem:[#allocation2] sm:$0x1] }
  0x17   :  { %158 = vperm.xlu0 %260, %v87_v8   ;;  %169 = vperm.xlu1 %261, %v166_v12   ;;  %v165_v26 = vld [vmem:[%s467_s5] sm:$0xff]  ;;  %s236_s5 = sshll.u32 %s471_s9, 4  ;;  %s237_s5 = int_to_ptr.hbm [resolvable:$true] %s236_s5 }
  0x18   :  { %v196_v31 = vld [vmem:[%s469_s7] sm:$0x1] }
  0x1e   :  { %248 = vmatmul.msk.f32.gmra.mxu0 %vm92_vm0, %v85_v9  ;;  %250 = vmatmul.msk.f32.gmra.mxu1 %vm92_vm0, %v83_v10 }
  0x1f   :  { %153 = vperm.xlu0 %260, %v86_v11   ;;  %200 = vperm.xlu1 %261, %v197_v13  }
  0x89   :  { %v159_v14 = vpop.permute.xlu0 %158  ;;  %v170_v27 = vpop.permute.xlu1 %169 }
  0x91   :  { %v154_v18 = vpop.permute.xlu0 %153  ;;  %v201_v32 = vpop.permute.xlu1 %200 }
  0x92   :  { %v203_v33 = vperm.slane %v201_v32, 0 }
  0x93   :  { %v116_v15 = vpop.f32.mrf.mxu0  ;;  %v145_v16 = vpop.f32.mrf.mxu1 }
  0x94   :  { %v146_v17 = vadd.f32 %v145_v16, %v116_v15 }
  0x96   :  { %v161_v22 = vadd.f32 %v154_v18, %v146_v17 }
  0x98   :  { %v163_v25 = vmax.f32 %v161_v22, 0.0 }
  0x9b   :  { %v119_v19 = vpop.f32.mrf.mxu0  ;;  %v148_v20 = vpop.f32.mrf.mxu1 }
  0x9c   :  { %v149_v21 = vadd.f32 %v148_v20, %v119_v19 }
  0x9e   :  { %v162_v23 = vadd.f32 %v159_v14, %v149_v21 }
  0xa0   :  { %v164_v24 = vmax.f32 %v162_v23, 0.0 }
  0xa2   :  { %189 = vmatpush.msra.mxu2 %v164_v24 }
  0xa4   :  { %190 = vmatpush.msra.mxu2 %v163_v25 }
  0xa5   :  { %251 = vmatmul.msk.f32.vlgmr.msra.gmra.mxu2 %vm92_vm0, %v165_v26 }
 0x128   :  { %v192_v28 = vpop.f32.mrf.mxu2 }
 0x129   :  { %v193_v29 = vadd.f32 %v192_v28, %v170_v27 }
 0x12b   :  { %v195_v30 = vmax.f32 %v193_v29, 0.0 }
 0x12d   :  { %223 = vmatpush.msra.mxu3 %v195_v30 }
 0x12e   :  { %252 = vmatmul.msk.f32.vlgmr.msra.gmra.mxu3 %vm204_vm1, %v196_v31 }
 0x1b1   :  { %v225_v34 = vpop.f32.mrf.mxu3 }
 0x1b2   :  { %v226_v35 = vadd.f32 %v225_v34, %v203_v33 }
 0x1b4   :  { %228 = vst [vmem:[#allocation9] sm:$0x1] %v226_v35 }
 0x1b5   :  { %239 = dma.vmem_to_hbm [thread:$0]  %s235_s15, 16, %s237_s5, [#allocation5]  }
 0x1b6   :  { %362 = dma.done.wait [#allocation5], 16  }
 0x1b7   :  { %363 = vsyncadd [#allocation5], 4294967280 }
 0x1b8   :  { %244 = vsyncpa [#allocation4], 1 }
 0x1b9   :  { %245 = vsyncpa [#allocation7], 1 }
 0x1ba   :  { %246 = vsyncpa [#allocation5], 1 }

</bundles_post_ra>
